<compile_context>
chip_gen: v6e
topology: v6e:2x2x1
jax: 0.10.0
libtpu: 0.0.40
codegen_flags: <defaults>
</compile_context>

<pallas_src>
import jax
import jax.numpy as jnp
from jax.experimental import pallas as pl
from jax.experimental.pallas import tpu as pltpu

N = 3  # logical matrix size (3x3 matrices in the module)


def _affine_kernel(w_ref, v3_ref, v8_ref, o_ref):
    """out = W_eff @ v3 + v8 on raw (3,3) blocks.

    w_ref  : (9,)  f32 in SMEM, row-major flattened W_eff.
    v3_ref : (3,3) f32 in VMEM (full-array block).
    v8_ref : (3,3) f32 in VMEM (full-array block).
    o_ref  : (3,3) f32 in VMEM (full-array block).

    The contraction is fully unrolled into 9 scalar x row-vector FMAs:
        out[i, :] = v8[i, :] + sum_k W_eff[i, k] * v3[k, :]
    Scalar reads come from SMEM (sld), row loads/stores are single vlds/vsts,
    multiplies stay in the VALU slot — no MXU, no XLU.
    """
    # Load each v3 row once (3 vlds), reuse across output rows.
    v3_rows = [v3_ref[k:k + 1, :] for k in range(N)]          # each (1, 3)
    for i in range(N):                                        # statically unrolled
        row = v8_ref[i:i + 1, :]                              # (1, 3)
        for k in range(N):
            row = row + w_ref[N * i + k] * v3_rows[k]         # scalar * vreg FMA
        o_ref[i:i + 1, :] = row


def make_params(key):
    """Build module parameters and the cached, flattened effective weight."""
    k_x1, k_x2, k_w1 = jax.random.split(key, 3)
    x1 = jax.random.normal(k_x1, (N, N), dtype=jnp.float32)
    x2 = jax.random.normal(k_x2, (N, N), dtype=jnp.float32)
    w1 = jax.random.normal(k_w1, (5, N), dtype=jnp.float32)

    # Constant-fold the parameter-only chain (input-independent), preserving
    # the reference left-to-right associativity.
    w1_used = w1[:N, :N]                      # see TODO(synk) above
    w_eff = ((x1 @ x2) @ w1_used) @ x2        # (3, 3)
    w_eff_flat = w_eff.reshape(-1).astype(jnp.float32)   # (9,) for SMEM

    return {"x1": x1, "x2": x2, "w1": w1, "w_eff_flat": w_eff_flat}


@jax.jit
def model_forward(w_eff_flat, v3, v8):
    """Forward pass: out = W_eff @ v3 + v8, one tiny Pallas call, no padding."""
    vmem_spec = pl.BlockSpec((N, N), lambda: (0, 0))   # full-array block in VMEM
    smem_spec = pl.BlockSpec(memory_space=pltpu.MemorySpace.SMEM)

    return pl.pallas_call(
        _affine_kernel,
        out_shape=jax.ShapeDtypeStruct((N, N), jnp.float32),
        grid=(),
        in_specs=[smem_spec, vmem_spec, vmem_spec],
        out_specs=vmem_spec,
        cost_estimate=pl.CostEstimate(
            flops=2 * N * N * N + N * N,                 # 63
            transcendentals=0,
            bytes_accessed=4 * (N * N * 3 + N * N),      # ~144 bytes
        ),
    )(w_eff_flat.astype(jnp.float32),
      v3.astype(jnp.float32),
      v8.astype(jnp.float32))


def reference_forward(params, v3, v8):
    """Pure-JAX reference matching the original torch module semantics."""
    x1, x2, w1 = params["x1"], params["x2"], params["w1"]
    w1_used = w1[:N, :N]                      # see TODO(synk) above
    t1 = x1 @ x2
    t2 = t1 @ w1_used
    v1 = t2 @ x2
    v2 = v1 @ v3
    return v2 + v8


if __name__ == "__main__":
    key = jax.random.PRNGKey(0)
    k_params, k_v3, k_v8 = jax.random.split(key, 3)

    # Module parameters (deterministic init, matching torch randn shapes).
    params = make_params(k_params)

    # Inputs.
    v3 = jax.random.normal(k_v3, (N, N), dtype=jnp.float32)
    v8 = jax.random.normal(k_v8, (N, N), dtype=jnp.float32)

    out = model_forward(params["w_eff_flat"], v3, v8)
    out = jax.block_until_ready(out)

    ref = reference_forward(params, v3, v8)
    assert out.shape == (N, N)
    assert jnp.allclose(out, ref, atol=1e-4, rtol=1e-4), (out, ref)

    print("KERNEL_OK")
</pallas_src>

<mosaic_0001>
module attributes {stable_mosaic.version = 11 : i64} {
  func.func @_affine_kernel(%arg0: memref<9xf32, #tpu.memory_space<smem>>, %arg1: memref<3x3xf32, #tpu.memory_space<vmem>>, %arg2: memref<3x3xf32, #tpu.memory_space<vmem>>, %arg3: memref<3x3xf32, #tpu.memory_space<vmem>>) attributes {dimension_semantics = [], scalar_prefetch = 0 : i64, scratch_operands = 0 : i64, tpu.core_type = #tpu.core_type<tc>} {
    %c0 = arith.constant 0 : index
    %c0_0 = arith.constant 0 : index
    %0 = vector.load %arg1[%c0, %c0_0] : memref<3x3xf32, #tpu.memory_space<vmem>>, vector<1x3xf32>
    %c1 = arith.constant 1 : index
    %c0_1 = arith.constant 0 : index
    %1 = vector.load %arg1[%c1, %c0_1] : memref<3x3xf32, #tpu.memory_space<vmem>>, vector<1x3xf32>
    %c2 = arith.constant 2 : index
    %c0_2 = arith.constant 0 : index
    %2 = vector.load %arg1[%c2, %c0_2] : memref<3x3xf32, #tpu.memory_space<vmem>>, vector<1x3xf32>
    %c0_3 = arith.constant 0 : index
    %c0_4 = arith.constant 0 : index
    %3 = vector.load %arg2[%c0_3, %c0_4] : memref<3x3xf32, #tpu.memory_space<vmem>>, vector<1x3xf32>
    %c0_5 = arith.constant 0 : index
    %4 = memref.load %arg0[%c0_5] : memref<9xf32, #tpu.memory_space<smem>>
    %5 = vector.broadcast %4 : f32 to vector<1x3xf32>
    %6 = arith.mulf %5, %0 : vector<1x3xf32>
    %7 = arith.addf %3, %6 : vector<1x3xf32>
    %c1_6 = arith.constant 1 : index
    %8 = memref.load %arg0[%c1_6] : memref<9xf32, #tpu.memory_space<smem>>
    %9 = vector.broadcast %8 : f32 to vector<1x3xf32>
    %10 = arith.mulf %9, %1 : vector<1x3xf32>
    %11 = arith.addf %7, %10 : vector<1x3xf32>
    %c2_7 = arith.constant 2 : index
    %12 = memref.load %arg0[%c2_7] : memref<9xf32, #tpu.memory_space<smem>>
    %13 = vector.broadcast %12 : f32 to vector<1x3xf32>
    %14 = arith.mulf %13, %2 : vector<1x3xf32>
    %15 = arith.addf %11, %14 : vector<1x3xf32>
    %c0_8 = arith.constant 0 : index
    %c0_9 = arith.constant 0 : index
    %16 = vector.load %arg3[%c0_8, %c0_9] : memref<3x3xf32, #tpu.memory_space<vmem>>, vector<1x3xf32>
    tpu.vector_store %arg3[%c0_8, %c0_9], %15 {strides = array<i32>} : memref<3x3xf32, #tpu.memory_space<vmem>>, vector<1x3xf32>,
    %c1_10 = arith.constant 1 : index
    %c0_11 = arith.constant 0 : index
    %17 = vector.load %arg2[%c1_10, %c0_11] : memref<3x3xf32, #tpu.memory_space<vmem>>, vector<1x3xf32>
    %c3 = arith.constant 3 : index
    %18 = memref.load %arg0[%c3] : memref<9xf32, #tpu.memory_space<smem>>
    %19 = vector.broadcast %18 : f32 to vector<1x3xf32>
    %20 = arith.mulf %19, %0 : vector<1x3xf32>
    %21 = arith.addf %17, %20 : vector<1x3xf32>
    %c4 = arith.constant 4 : index
    %22 = memref.load %arg0[%c4] : memref<9xf32, #tpu.memory_space<smem>>
    %23 = vector.broadcast %22 : f32 to vector<1x3xf32>
    %24 = arith.mulf %23, %1 : vector<1x3xf32>
    %25 = arith.addf %21, %24 : vector<1x3xf32>
    %c5 = arith.constant 5 : index
    %26 = memref.load %arg0[%c5] : memref<9xf32, #tpu.memory_space<smem>>
    %27 = vector.broadcast %26 : f32 to vector<1x3xf32>
    %28 = arith.mulf %27, %2 : vector<1x3xf32>
    %29 = arith.addf %25, %28 : vector<1x3xf32>
    %c1_12 = arith.constant 1 : index
    %c0_13 = arith.constant 0 : index
    %30 = vector.load %arg3[%c1_12, %c0_13] : memref<3x3xf32, #tpu.memory_space<vmem>>, vector<1x3xf32>
    tpu.vector_store %arg3[%c1_12, %c0_13], %29 {strides = array<i32>} : memref<3x3xf32, #tpu.memory_space<vmem>>, vector<1x3xf32>,
    %c2_14 = arith.constant 2 : index
    %c0_15 = arith.constant 0 : index
    %31 = vector.load %arg2[%c2_14, %c0_15] : memref<3x3xf32, #tpu.memory_space<vmem>>, vector<1x3xf32>
    %c6 = arith.constant 6 : index
    %32 = memref.load %arg0[%c6] : memref<9xf32, #tpu.memory_space<smem>>
    %33 = vector.broadcast %32 : f32 to vector<1x3xf32>
    %34 = arith.mulf %33, %0 : vector<1x3xf32>
    %35 = arith.addf %31, %34 : vector<1x3xf32>
    %c7 = arith.constant 7 : index
    %36 = memref.load %arg0[%c7] : memref<9xf32, #tpu.memory_space<smem>>
    %37 = vector.broadcast %36 : f32 to vector<1x3xf32>
    %38 = arith.mulf %37, %1 : vector<1x3xf32>
    %39 = arith.addf %35, %38 : vector<1x3xf32>
    %c8 = arith.constant 8 : index
    %40 = memref.load %arg0[%c8] : memref<9xf32, #tpu.memory_space<smem>>
    %41 = vector.broadcast %40 : f32 to vector<1x3xf32>
    %42 = arith.mulf %41, %2 : vector<1x3xf32>
    %43 = arith.addf %39, %42 : vector<1x3xf32>
    %c2_16 = arith.constant 2 : index
    %c0_17 = arith.constant 0 : index
    %44 = vector.load %arg3[%c2_16, %c0_17] : memref<3x3xf32, #tpu.memory_space<vmem>>, vector<1x3xf32>
    tpu.vector_store %arg3[%c2_16, %c0_17], %43 {strides = array<i32>} : memref<3x3xf32, #tpu.memory_space<vmem>>, vector<1x3xf32>,
    return
  }
}

</mosaic_0001>

<bundles_post_ra>
// kernel: model_forward.1
= control target key start
LH: loop header
LB: loop body
LE: loop exit
PB: predicated region body
PF: predicated region fallthrough
CT: control target
= control target key end

     0   :  { %8 = vsyncpa [#allocation5], 0  ;;  %s240_s0 = inlined_call_operand.hbm [shape: f32[9], index: 0, kind: input, shape index: {}]   ;;  %s241_s1 = inlined_call_operand.hbm [shape: f32[3,3], index: 1, kind: input, shape index: {}]   ;;  %s242_s2 = inlined_call_operand.hbm [shape: f32[3,3], index: 2, kind: input, shape index: {}]   ;;  %s243_s3 = inlined_call_operand.hbm [shape: f32[3,3], index: 3, kind: output, shape index: {}]  }
   0x1   :  { %9 = vsyncpa [#allocation3], 0 }
   0x2   :  { %10 = vsyncpa [#allocation8], 0 }
   0x3   :  { %11 = vsyncpa [#allocation4], 0  ;;  %s201_s12 = smov [#allocation2]   ;;  %s202_s15 = smov [#allocation6]  }
   0x4   :  { %19 = dma.hbm_to_smem %s240_s0, 16, %s201_s12, [#allocation5]  }
   0x5   :  { %s26_s16 = sshll.u32 %s202_s15, 4  ;;  %s203_s17 = smov [#allocation7]   ;;  %s27_s16 = int_to_ptr.vmem [resolvable:$true] %s26_s16 }
   0x6   :  { %s36_s18 = sshll.u32 %s203_s17, 4  ;;  %s141_s19 = scalar_lea.vmem %s27_s16, 64  ;;  %s37_s18 = int_to_ptr.vmem [resolvable:$true] %s36_s18 }
   0x7   :  { %p142_p0 = scmp.ne.s32.totalorder %s27_s16, %s141_s19  ;;  %p146_p1 = scmp.lt.s32.totalorder %s27_s16, %s27_s16 }
   0x8   :  { %p147_p2 = scmp.lt.s32.totalorder %s141_s19, %s141_s19 }
   0xa   :  { %p148_p3 = por %p147_p2, %p146_p1 }
   0xc   :  { %p149_p4 = pnand %p148_p3, %p142_p0 }
   0xe   :  { %152 = shalt.err (!%p149_p4)
}
   0xf   :  { %29 = dma.hbm_to_vmem [thread:$0]  %s241_s1, 64, %s27_s16, [#allocation3]  }
  0x10   :  { %s161_s22 = scalar_lea.vmem %s37_s18, 64  ;;  %p166_p6 = scmp.lt.s32.totalorder %s37_s18, %s37_s18 }
  0x11   :  { %p162_p5 = scmp.ne.s32.totalorder %s37_s18, %s161_s22  ;;  %p167_p7 = scmp.lt.s32.totalorder %s161_s22, %s161_s22 }
  0x13   :  { %p168_p8 = por %p167_p7, %p166_p6 }
  0x15   :  { %p169_p9 = pnand %p168_p8, %p162_p5 }
  0x17   :  { %172 = shalt.err (!%p169_p9)
}
  0x18   :  { %39 = dma.hbm_to_vmem [thread:$0]  %s242_s2, 64, %s37_s18, [#allocation8]  }
  0x19   :  { %193 = dma.done.wait [#allocation5], 16  }
  0x1a   :  { %194 = vsyncadd [#allocation5], 4294967280 }
  0x1b   :  { %195 = dma.done.wait [#allocation3], 64  }
  0x1c   :  { %196 = vsyncadd [#allocation3], 4294967232 }
  0x1d   :  { %197 = dma.done.wait [#allocation8], 64  }
  0x1e   :  { %198 = vsyncadd [#allocation8], 4294967232 }
  0x1f   :  { %49 = sfence }
  0x20   :  { %s54_s1 = sld [smem:[#allocation2]]  ;;  %v50_v0 = vld [vmem:[#allocation6] sm:$0x1]  ;;  %v51_v1 = vld [vmem:[#allocation6 + $0x1] sm:$0x1]  ;;  %vm66_vm0 = vcmask 16384  }
  0x21   :  { %s113_s24 = sld [smem:[#allocation2 + $0x1]]  ;;  %v52_v2 = vld [vmem:[#allocation6 + $0x2] sm:$0x1]  ;;  %v53_v3 = vld [vmem:[#allocation7] sm:$0x1]  ;;  %s204_s4 = smov [#allocation9]  }
  0x22   :  { %s114_s25 = sld [smem:[#allocation2 + $0x2]]  ;;  %v68_v11 = vld [vmem:[#allocation7 + $0x1] sm:$0x1]  ;;  %v82_v20 = vld [vmem:[#allocation7 + $0x2] sm:$0x1]  ;;  %s102_s5 = sshll.u32 %s204_s4, 4  ;;  %s103_s5 = int_to_ptr.vmem [resolvable:$true] %s102_s5 }
  0x23   :  { %s115_s26 = sld [smem:[#allocation2 + $0x3]]  ;;  %s173_s6 = scalar_lea.vmem %s103_s5, 64 }
  0x24   :  { %s116_s27 = sld [smem:[#allocation2 + $0x4]]  ;;  %p174_p10 = scmp.ne.s32.totalorder %s103_s5, %s173_s6 }
  0x25   :  { %s117_s28 = sld [smem:[#allocation2 + $0x5]]  ;;  %p178_p11 = scmp.lt.s32.totalorder %s103_s5, %s103_s5 }
  0x26   :  { %v55_v4 = vstv %s54_s1  ;;  %s118_s29 = sld [smem:[#allocation2 + $0x6]]  ;;  %p179_p12 = scmp.lt.s32.totalorder %s173_s6, %s173_s6 }
  0x27   :  { %v56_v5 = vmul.f32 %v55_v4, %v50_v0  ;;  %v59_v6 = vstv %s113_s24  ;;  %s119_s2 = sld [smem:[#allocation2 + $0x7]] }
  0x28   :  { %v60_v7 = vmul.f32 %v59_v6, %v51_v1  ;;  %v63_v8 = vstv %s114_s25  ;;  %s120_s30 = sld [smem:[#allocation2 + $0x8]]  ;;  %p180_p13 = por %p179_p12, %p178_p11 }
  0x29   :  { %v57_v9 = vadd.f32 %v56_v5, %v53_v3  ;;  %v64_v10 = vmul.f32 %v63_v8, %v52_v2  ;;  %v70_v12 = vstv %s115_s26 }
  0x2a   :  { %v71_v13 = vmul.f32 %v70_v12, %v50_v0  ;;  %v74_v14 = vstv %s116_s27  ;;  %p181_p0 = pnand %p180_p13, %p174_p10 }
  0x2b   :  { %v61_v15 = vadd.f32 %v60_v7, %v57_v9  ;;  %v75_v16 = vmul.f32 %v74_v14, %v51_v1  ;;  %v78_v17 = vstv %s117_s28 }
  0x2c   :  { %v72_v18 = vadd.f32 %v71_v13, %v68_v11  ;;  %v79_v19 = vmul.f32 %v78_v17, %v52_v2  ;;  %v84_v21 = vstv %s118_s29 }
  0x2d   :  { %v65_v22 = vadd.f32 %v64_v10, %v61_v15  ;;  %v85_v23 = vmul.f32 %v84_v21, %v50_v0  ;;  %v88_v24 = vstv %s119_s2 }
  0x2e   :  { %v76_v25 = vadd.f32 %v75_v16, %v72_v18  ;;  %v89_v26 = vmul.f32 %v88_v24, %v51_v1  ;;  %v92_v27 = vstv %s120_s30 }
  0x2f   :  { %67 = vst.msk [vmem:[#allocation9] sm:$0x1] %vm66_vm0, %v65_v22  ;;  %v86_v28 = vadd.f32 %v85_v23, %v82_v20  ;;  %v93_v29 = vmul.f32 %v92_v27, %v52_v2 }
  0x30   :  { %v80_v30 = vadd.f32 %v79_v19, %v76_v25 }
  0x31   :  { %v90_v31 = vadd.f32 %v89_v26, %v86_v28 }
  0x32   :  { %81 = vst.msk [vmem:[#allocation9 + $0x1] sm:$0x1] %vm66_vm0, %v80_v30 }
  0x33   :  { %v94_v32 = vadd.f32 %v93_v29, %v90_v31 }
  0x35   :  { %95 = vst.msk [vmem:[#allocation9 + $0x2] sm:$0x1] %vm66_vm0, %v94_v32 }
  0x36   :  { %184 = shalt.err (!%p181_p0)
}
  0x37   :  { %105 = dma.vmem_to_hbm [thread:$0]  %s103_s5, 64, %s243_s3, [#allocation4]  }
  0x38   :  { %199 = dma.done.wait [#allocation4], 64  }
  0x39   :  { %200 = vsyncadd [#allocation4], 4294967232 }
  0x3a   :  { %109 = vsyncpa [#allocation3], 1 }
  0x3b   :  { %110 = vsyncpa [#allocation8], 1 }
  0x3c   :  { %111 = vsyncpa [#allocation4], 1 }
  0x3d   :  { %112 = vsyncpa [#allocation5], 1 }

</bundles_post_ra>
